<compile_context>
chip_gen: v5e
topology: v5e:2x2
jax: 0.10.0
libtpu: 0.0.40
codegen_flags: <defaults>
</compile_context>

<pallas_src>
import math

import jax
import jax.numpy as jnp
from jax.experimental import pallas as pl
from jax.experimental.pallas import tpu as pltpu


# --------------------------------------------------------------------------
# Helpers
# --------------------------------------------------------------------------
def _round_up(x, m):
    return ((x + m - 1) // m) * m


def _tpu_budgets():
    """Return (generation, vmem_limit_bytes, single-copy tile budget bytes)."""
    gen = 6
    try:
        kind = jax.devices()[0].device_kind.lower()
        for g in (7, 6, 5, 4):
            if f"v{g}" in kind:
                gen = g
                break
    except Exception:
        pass
    if gen >= 7:
        # v7x: 64 MiB physical VMEM per TensorCore -> leave Mosaic headroom.
        return gen, 48 << 20, 7 << 20
    # v5e / v6e: 128 MiB physical VMEM -> use most of it.
    return gen, 100 << 20, 12 << 20


def _largest_divisor(n, cap, multiple_of=1):
    """Largest d <= cap with d % multiple_of == 0 and n % d == 0 (fallback: multiple_of)."""
    best = multiple_of
    d = multiple_of
    cap = max(multiple_of, min(cap, n))
    while d <= cap:
        if n % d == 0:
            best = d
        d += multiple_of
    return best


def _pick_bt(B, S, Dp, x_size, out_size, target_bytes):
    """Batch rows per kernel-B grid step: single-copy working set <= target,
    at least 2 grid steps, and an even step count when cheaply reachable."""
    per_b = S * Dp * (x_size + out_size) + Dp * Dp * 4
    bt0 = max(1, min(B, int(target_bytes) // max(per_b, 1)))
    if B > 1:
        bt0 = min(bt0, -(-B // 2))  # at least 2 grid steps
    for cand in range(bt0, max(0, bt0 - 64), -1):
        if (-(-B // cand)) % 2 == 0:     # even grid -> balanced v7x megacore split
            return cand
    return bt0


# --------------------------------------------------------------------------
# One-time parameter preparation (hoisted out of the forward call)
# --------------------------------------------------------------------------
def prepare_modulate_params(w_gen, b_gen, input_size):
    """Permute nn.Linear weights so the generator emits para^T directly, and
    pre-cast the weight to bf16 (MXU operand dtype).  Call once at model init.

    w_gen: [D*D, E] (PyTorch [out, in]),  b_gen: [D*D]
    """
    D = int(input_size)
    E = w_gen.shape[-1]
    # w_perm_t[e, j*D + i] = w_gen[i*D + j, e]
    w_perm_t = jnp.transpose(w_gen.reshape(D, D, E), (2, 1, 0)).reshape(E, D * D)
    w_perm_t = w_perm_t.astype(jnp.bfloat16)
    b_perm = b_gen.reshape(D, D).T.reshape(1, D * D).astype(jnp.float32)
    return w_perm_t, b_perm


# --------------------------------------------------------------------------
# Kernel A: batched parameter generation (gen_para's nn.Linear), permuted so it
#           produces para^T flat along the last axis.  f32 output.
# --------------------------------------------------------------------------
def _gen_para_kernel(be_ref, w_ref, b_ref, o_ref):
    """be_ref: (Bm, E) f32 | w_ref: (E, tn) bf16 | b_ref: (1, tn) f32 | o_ref: (Bm, tn) f32."""
    acc = jnp.dot(
        be_ref[...].astype(jnp.bfloat16),
        w_ref[...],
        preferred_element_type=jnp.float32,
    )
    o_ref[...] = (acc + b_ref[...]).astype(o_ref.dtype)


# --------------------------------------------------------------------------
# Kernel B: forward pass  out[b] = x[b] @ para_t[b]    (para_t == para^T)
# --------------------------------------------------------------------------
def _modulate_fwd_kernel(x_ref, p_ref, o_ref):
    """x_ref: (bt, S, Dp) | p_ref: (bt, Dp, Dp) f32 | o_ref: (bt, S, Dp)."""
    out = jnp.einsum(
        "bsd,bde->bse",
        x_ref[...].astype(jnp.bfloat16),
        p_ref[...].astype(jnp.bfloat16),
        preferred_element_type=jnp.float32,
    )
    o_ref[...] = out.astype(o_ref.dtype)


# --------------------------------------------------------------------------
# Wrapper
# --------------------------------------------------------------------------
def modulate_hidden(x, bias_emb, params):
    """x: [B, S, D], bias_emb: [B, E], params = prepare_modulate_params(...)."""
    w_perm_t, b_perm = params
    B, S, D = x.shape
    E = bias_emb.shape[-1]
    DD = D * D
    gen, vmem_cap, tile_budget = _tpu_budgets()

    # ---- kernel A: para_t_flat = bias_emb @ w_perm_t + b_perm ---------------
    if DD <= 4096:
        tn = DD
    else:
        tn = _largest_divisor(DD, 4096, 128)
        if DD % tn != 0:
            tn = DD
    Bm = B if B <= 512 else 512                       # 512 is a multiple of 8
    grid_a = (pl.cdiv(B, Bm), pl.cdiv(DD, tn))
    para_flat = pl.pallas_call(
        _gen_para_kernel,
        out_shape=jax.ShapeDtypeStruct((B, DD), jnp.float32),
        grid_spec=pltpu.PrefetchScalarGridSpec(
            num_scalar_prefetch=0,
            grid=grid_a,
            in_specs=[
                pl.BlockSpec((Bm, E), lambda m, n: (m, 0)),    # bias_emb rows
                pl.BlockSpec((E, tn), lambda m, n: (0, n)),    # permuted weight (bf16)
                pl.BlockSpec((1, tn), lambda m, n: (0, n)),    # permuted bias (f32)
            ],
            out_specs=pl.BlockSpec((Bm, tn), lambda m, n: (m, n)),
        ),
        compiler_params=pltpu.CompilerParams(
            dimension_semantics=("parallel", "parallel"),
            vmem_limit_bytes=int(vmem_cap),
        ),
        cost_estimate=pl.CostEstimate(
            flops=2 * B * E * DD,
            transcendentals=0,
            bytes_accessed=B * E * 4 + E * DD * 2 + DD * 4 + B * DD * 4,
        ),
    )(bias_emb, w_perm_t, b_perm)

    # free row-major reshape in XLA: (B, D*D) -> (B, D, D)
    para_t = para_flat.reshape(B, D, D)

    # ---- lane-density padding: D -> multiple of 128 --------------------------
    Dp = D if D % 128 == 0 else _round_up(D, 128)
    if Dp != D:
        para_t = jnp.pad(para_t, ((0, 0), (0, Dp - D), (0, Dp - D)))
        x_p = jnp.pad(x, ((0, 0), (0, 0), (0, Dp - D)))
    else:
        x_p = x

    # ---- kernel B: out[b] = x[b] @ para_t[b] ---------------------------------
    x_size = x.dtype.itemsize
    bt = _pick_bt(B, S, Dp, x_size, x_size, tile_budget)
    grid_b = (pl.cdiv(B, bt),)

    idx3 = lambda i: (i, 0, 0)
    x_spec = pl.BlockSpec((bt, S, Dp), idx3)
    if gen >= 7:
        try:   # deepen the prefetch pipeline on v7x (3.2 TB/s HBM)
            x_spec = pl.BlockSpec((bt, S, Dp), idx3, pipeline_mode=pl.Buffered(3))
        except (TypeError, AttributeError):
            x_spec = pl.BlockSpec((bt, S, Dp), idx3)

    out_p = pl.pallas_call(
        _modulate_fwd_kernel,
        out_shape=jax.ShapeDtypeStruct((B, S, Dp), x.dtype),
        grid_spec=pltpu.PrefetchScalarGridSpec(
            num_scalar_prefetch=0,
            grid=grid_b,
            in_specs=[
                x_spec,                                    # input tile (lane-dense)
                pl.BlockSpec((bt, Dp, Dp), idx3),          # per-batch para^T (f32)
            ],
            out_specs=pl.BlockSpec((bt, S, Dp), idx3),
        ),
        compiler_params=pltpu.CompilerParams(
            dimension_semantics=("parallel",),
            vmem_limit_bytes=int(vmem_cap),
        ),
        cost_estimate=pl.CostEstimate(
            flops=2 * B * S * Dp * Dp,
            transcendentals=0,
            bytes_accessed=2 * B * S * Dp * x_size + B * Dp * Dp * 4,
        ),
    )(x_p, para_t)

    return out_p[:, :, :D] if Dp != D else out_p


if __name__ == "__main__":
    B, S, D, E = 2, 8, 32, 16  # batch, seq, input_size (hidden), emb_size

    key = jax.random.PRNGKey(0)
    k_x, k_be, k_w, k_b = jax.random.split(key, 4)

    x = jax.random.normal(k_x, (B, S, D), dtype=jnp.float32)
    bias_emb = jax.random.normal(k_be, (B, E), dtype=jnp.float32)

    # Deterministic init mimicking nn.Linear defaults: U(-1/sqrt(fan_in), 1/sqrt(fan_in))
    bound = 1.0 / math.sqrt(E)
    w_gen = jax.random.uniform(k_w, (D * D, E), jnp.float32, minval=-bound, maxval=bound)
    b_gen = jax.random.uniform(k_b, (D * D,), jnp.float32, minval=-bound, maxval=bound)

    # One-time (model-init) weight layout prep, hoisted out of the forward call.
    params = prepare_modulate_params(w_gen, b_gen, D)

    out = modulate_hidden(x, bias_emb, params)
    out = jax.block_until_ready(out)

    # Pure-JAX f32 reference (same math as the PyTorch module)
    para_ref = (bias_emb @ w_gen.T + b_gen).reshape(B, D, D)
    out_ref = jnp.einsum("bsd,bed->bse", x, para_ref)

    assert out.shape == (B, S, D)
    # bf16 MXU operands with f32 accumulation -> norm-relative tolerance
    rel = jnp.linalg.norm(out.astype(jnp.float32) - out_ref) / jnp.linalg.norm(out_ref)
    assert rel < 3e-2, f"relative error too large: {rel}"
    print("KERNEL_OK")
</pallas_src>

<mosaic_0001>
module attributes {stable_mosaic.version = 11 : i64} {
  func.func @_gen_para_kernel(%arg0: i32, %arg1: i32, %arg2: memref<2x16xf32, #tpu.memory_space<vmem>>, %arg3: memref<16x1024xbf16, #tpu.memory_space<vmem>>, %arg4: memref<1x1024xf32, #tpu.memory_space<vmem>>, %arg5: memref<2x1024xf32, #tpu.memory_space<vmem>>) attributes {dimension_semantics = [#tpu.dimension_semantics<parallel>, #tpu.dimension_semantics<parallel>], iteration_bounds = array<i64: 1, 1>, scalar_prefetch = 0 : i64, scratch_operands = 0 : i64, tpu.core_type = #tpu.core_type<tc>, window_params = [{transform_indices = @transform_0, window_bounds = array<i64: 2, 16>}, {transform_indices = @transform_1, window_bounds = array<i64: 16, 1024>}, {transform_indices = @transform_2, window_bounds = array<i64: 1, 1024>}, {transform_indices = @transform_3, window_bounds = array<i64: 2, 1024>}]} {
    %c0 = arith.constant 0 : index
    %c0_0 = arith.constant 0 : index
    %0 = vector.load %arg2[%c0, %c0_0] : memref<2x16xf32, #tpu.memory_space<vmem>>, vector<2x16xf32>
    %1 = arith.truncf %0 : vector<2x16xf32> to vector<2x16xbf16>
    %c0_1 = arith.constant 0 : index
    %c0_2 = arith.constant 0 : index
    %2 = vector.load %arg3[%c0_1, %c0_2] : memref<16x1024xbf16, #tpu.memory_space<vmem>>, vector<16x1024xbf16>
    %cst = arith.constant dense<0.000000e+00> : vector<2x1024xf32>
    %3 = tpu.matmul %1, %2, %cst {dimension_numbers = #tpu.dot_dimension_numbers<[1], [0], [0], [1], [0, 0, 1, 1], [], []>} : vector<2x16xbf16>, vector<16x1024xbf16>, vector<2x1024xf32> -> vector<2x1024xf32>
    %c0_3 = arith.constant 0 : index
    %c0_4 = arith.constant 0 : index
    %4 = vector.load %arg4[%c0_3, %c0_4] : memref<1x1024xf32, #tpu.memory_space<vmem>>, vector<1x1024xf32>
    %5 = vector.broadcast %4 : vector<1x1024xf32> to vector<2x1024xf32>
    %6 = arith.addf %3, %5 : vector<2x1024xf32>
    %c0_5 = arith.constant 0 : index
    %c0_6 = arith.constant 0 : index
    %7 = vector.load %arg5[%c0_5, %c0_6] : memref<2x1024xf32, #tpu.memory_space<vmem>>, vector<2x1024xf32>
    tpu.vector_store %arg5[%c0_5, %c0_6], %6 {strides = array<i32>} : memref<2x1024xf32, #tpu.memory_space<vmem>>, vector<2x1024xf32>,
    return
  }
  func.func @transform_0(%arg0: i32, %arg1: i32) -> (i32, i32) {
    %c0_i32 = arith.constant 0 : i32
    %c0_i32_0 = arith.constant 0 : i32
    return %arg0, %c0_i32 : i32, i32
  }
  func.func @transform_1(%arg0: i32, %arg1: i32) -> (i32, i32) {
    %c0_i32 = arith.constant 0 : i32
    %c0_i32_0 = arith.constant 0 : i32
    return %c0_i32, %arg1 : i32, i32
  }
  func.func @transform_2(%arg0: i32, %arg1: i32) -> (i32, i32) {
    %c0_i32 = arith.constant 0 : i32
    %c0_i32_0 = arith.constant 0 : i32
    return %c0_i32, %arg1 : i32, i32
  }
  func.func @transform_3(%arg0: i32, %arg1: i32) -> (i32, i32) {
    %c0_i32 = arith.constant 0 : i32
    return %arg0, %arg1 : i32, i32
  }
}

</mosaic_0001>

<bundles_post_ra>
// kernel: tpu_custom_call.1
= control target key start
LH: loop header
LB: loop body
LE: loop exit
PB: predicated region body
PF: predicated region fallthrough
CT: control target
= control target key end

     0   :  { %8 = vsyncpa [#allocation3], 0  ;;  %s488_s0 = inlined_call_operand.hbm [shape: f32[2,16], index: 0, kind: input, shape index: {}]   ;;  %s489_s1 = inlined_call_operand.hbm [shape: bf16[16,1024], index: 1, kind: input, shape index: {}]   ;;  %s490_s2 = inlined_call_operand.hbm [shape: f32[1,1024], index: 2, kind: input, shape index: {}]   ;;  %s491_s3 = inlined_call_operand.hbm [shape: f32[2,1024], index: 3, kind: output, shape index: {}]  }
   0x1   :  { %9 = vsyncpa [#allocation6], 0  ;;  %s26_s14 = sshll.u32 %s489_s1, 4  ;;  %s27_s14 = int_to_ptr.hbm [resolvable:$true] %s26_s14 }
   0x2   :  { %10 = vsyncpa [#allocation4], 0  ;;  %s436_s15 = smov [#allocation5]   ;;  %s16_s19 = sshll.u32 %s488_s0, 4  ;;  %s17_s19 = int_to_ptr.hbm [resolvable:$true] %s16_s19 }
   0x3   :  { %s28_s16 = sshll.u32 %s436_s15, 4  ;;  %s437_s20 = smov 512   ;;  %s29_s16 = int_to_ptr.vmem [resolvable:$true] %s28_s16 }
   0x4   :  { %s438_s21 = smov 32   ;;  %s439_s22 = smov [#allocation2]  }
   0x5   :  { %34 = dma.hbm_to_vmem [thread:$0]  %s27_s14, 1024, %s29_s16, [#allocation6], %s437_s20, %s437_s20, %s438_s21  }
   0x6   :  { %s18_s23 = sshll.u32 %s439_s22, 4  ;;  %s40_s26 = sshll.u32 %s490_s2, 4  ;;  %s19_s23 = int_to_ptr.vmem [resolvable:$true] %s18_s23  ;;  %s41_s26 = int_to_ptr.hbm [resolvable:$true] %s40_s26 }
   0x7   :  { %21 = dma.hbm_to_vmem [thread:$0]  %s17_s19, 32, %s19_s23, [#allocation3]  }
   0x8   :  { %s440_s1 = smov [#allocation7]  }
   0x9   :  { %s42_s27 = sshll.u32 %s440_s1, 4  ;;  %s43_s27 = int_to_ptr.vmem [resolvable:$true] %s42_s27 }
   0xa   :  { %45 = dma.hbm_to_vmem [thread:$0]  %s41_s26, 128, %s43_s27, [#allocation6]  }
   0xb   :  { %430 = dma.done.wait [#allocation3], 32  }
   0xc   :  { %431 = vsyncadd [#allocation3], 4294967264 }
   0xd   :  { %432 = dma.done.wait [#allocation6], 1152  }
   0xe   :  { %433 = vsyncadd [#allocation6], 4294966144  ;;  %vm127_vm0 = vcmask 130048   ;;  %v282_v0 = vld [vmem:[#allocation5] sm:$0xf]  ;;  %vm249_vm1 = vcmask 1041408  }
   0xf   :  { %v324_v1 = vld [vmem:[#allocation5 + $0x1c] sm:$0xf0]  ;;  %v320_v2 = vld [vmem:[#allocation5 + $0x4] sm:$0xf]  ;;  %v290_v5 = vld [vmem:[#allocation5 + $0x8] sm:$0xf] }
  0x10   :  { %v283_v3 = vor.u32 %v324_v1, %v282_v0  ;;  %v284_v4 = vld [vmem:[#allocation5 + $0x20] sm:$0xf0]  ;;  %v325_v6 = vld [vmem:[#allocation5 + $0x24] sm:$0xf0]  ;;  %v321_v9 = vld [vmem:[#allocation5 + $0xc] sm:$0xf] }
  0x11   :  { %v287_v7 = vor.u32 %v320_v2, %v284_v4  ;;  %v291_v8 = vor.u32 %v325_v6, %v290_v5  ;;  %v292_v10 = vld [vmem:[#allocation5 + $0x28] sm:$0xf0]  ;;  %v59_v11 = vld [vmem:[#allocation2] sm:$0x3]  ;;  %v306_v14 = vld [vmem:[#allocation5 + $0x18] sm:$0xf] }
  0x12   :  { %138 = vmatpush.bf16.msra.mxu0 %v283_v3  ;;  %v295_v12 = vor.u32 %v321_v9, %v292_v10  ;;  %v60_v13 = vpack.c.bf16 %v59_v11, %v59_v11  ;;  %v327_v15 = vld [vmem:[#allocation5 + $0x34] sm:$0xf0]  ;;  %v323_v16 = vld [vmem:[#allocation5 + $0x1c] sm:$0xf]  ;;  %v298_v19 = vld [vmem:[#allocation5 + $0x10] sm:$0xf] }
  0x13   :  { %151 = vmatpush.bf16.msra.mxu1 %v287_v7  ;;  %164 = vmatpush.bf16.msra.mxu2 %v291_v8  ;;  %v307_v17 = vor.u32 %v327_v15, %v306_v14  ;;  %v308_v18 = vld [vmem:[#allocation5 + $0x38] sm:$0xf0]  ;;  %v326_v20 = vld [vmem:[#allocation5 + $0x2c] sm:$0xf0]  ;;  %v322_v23 = vld [vmem:[#allocation5 + $0x14] sm:$0xf] }
  0x14   :  { %177 = vmatpush.bf16.msra.mxu3 %v295_v12  ;;  %v311_v21 = vor.u32 %v323_v16, %v308_v18  ;;  %v299_v22 = vor.u32 %v326_v20, %v298_v19  ;;  %v300_v24 = vld [vmem:[#allocation5 + $0x30] sm:$0xf0]  ;;  %v69_v26 = vld [vmem:[#allocation7] sm:$0xff]  ;;  %vm251_vm2 = vcmask 1045508   ;;  %vm253_vm3 = vcmask 1043456   ;;  %s441_s0 = smov [#allocation8]  }
  0x15   :  { %312 = vmatmul.msk.bf16.vlgmr.msra.gmra.mxu0 %vm127_vm0, %v60_v13  ;;  %v303_v25 = vor.u32 %v322_v23, %v300_v24  ;;  %v72_v28 = vperm.slane %v69_v26, 1  ;;  %v73_v30 = vperm.slane %v69_v26, 2  ;;  %v71_v31 = vperm.slane %v69_v26, 0  ;;  %s267_s2 = sshll.u32 %s441_s0, 4  ;;  %s269_s30 = sshll.u32 %s491_s3, 4  ;;  %s268_s2 = int_to_ptr.vmem [resolvable:$true] %s267_s2  ;;  %s270_s30 = int_to_ptr.hbm [resolvable:$true] %s269_s30 }
  0x16   :  { %313 = vmatmul.msk.bf16.vlgmr.msra.gmra.mxu1 %vm127_vm0, %v60_v13  ;;  %314 = vmatmul.msk.bf16.vlgmr.msra.gmra.mxu2 %vm127_vm0, %v60_v13  ;;  %v74_v33 = vperm.slane %v69_v26, 3  ;;  %v76_v50 = vperm.slane %v69_v26, 5  ;;  %v77_v52 = vperm.slane %v69_v26, 6  ;;  %v75_v53 = vperm.slane %v69_v26, 4 }
  0x17   :  { %216 = vmatpush.bf16.msrb.mxu2 %v307_v17  ;;  %315 = vmatmul.msk.bf16.vlgmr.msra.gmra.mxu3 %vm127_vm0, %v60_v13  ;;  %v78_v55 = vperm.slane %v69_v26, 7 }
  0x18   :  { %190 = vmatpush.bf16.msrb.mxu0 %v299_v22  ;;  %229 = vmatpush.bf16.msrb.mxu3 %v311_v21 }
  0x19   :  { %203 = vmatpush.bf16.msrb.mxu1 %v303_v25 }
  0x25   :  { %316 = vmatmul.msk.bf16.vlgmr.msrb.gmra.mxu0 %vm127_vm0, %v60_v13 }
  0x26   :  { %317 = vmatmul.msk.bf16.vlgmr.msrb.gmra.mxu1 %vm127_vm0, %v60_v13  ;;  %318 = vmatmul.msk.bf16.vlgmr.msrb.gmra.mxu2 %vm127_vm0, %v60_v13 }
  0x27   :  { %319 = vmatmul.msk.bf16.vlgmr.msrb.gmra.mxu3 %vm127_vm0, %v60_v13 }
  0x92   :  { %v140_v27 = vpop.f32.mrf.mxu0 }
  0x93   :  { %v153_v29 = vpop.f32.mrf.mxu1  ;;  %v141_v38 = vadd.f32 %v140_v27, %v71_v31 }
  0x94   :  { %v154_v32 = vadd.f32 %v153_v29, %v72_v28 }
  0x96   :  { %v243_v39 = vrot.slane %v154_v32, 6 }
  0x98   :  { %v250_v44 = vsel %vm249_vm1, %v141_v38, %v243_v39 }
  0x99   :  { %v166_v34 = vpop.f32.mrf.mxu2 }
  0x9a   :  { %v167_v35 = vadd.f32 %v166_v34, %v73_v30  ;;  %v179_v36 = vpop.f32.mrf.mxu3  ;;  %v142_v37 = vpop.f32.mrf.mxu0 }
  0x9b   :  { %v180_v40 = vadd.f32 %v179_v36, %v74_v33  ;;  %v155_v41 = vpop.f32.mrf.mxu1 }
  0x9c   :  { %v244_v42 = vrot.slane %v167_v35, 4 }
  0x9d   :  { %v245_v43 = vrot.slane %v180_v40, 2 }
  0x9f   :  { %v252_v45 = vsel %vm251_vm2, %v244_v42, %v245_v43 }
  0xa0   :  { %v254_v46 = vsel %vm253_vm3, %v250_v44, %v252_v45 }
  0xa1   :  { %v168_v47 = vpop.f32.mrf.mxu2  ;;  %260 = vst [vmem:[#allocation8] sm:$0xff] %v254_v46 }
  0xa2   :  { %v181_v48 = vpop.f32.mrf.mxu3  ;;  %v192_v49 = vpop.f32.mrf.mxu0 }
  0xa3   :  { %v205_v51 = vpop.f32.mrf.mxu1  ;;  %v193_v60 = vadd.f32 %v192_v49, %v75_v53 }
  0xa4   :  { %v206_v54 = vadd.f32 %v205_v51, %v76_v50 }
  0xa6   :  { %v246_v61 = vrot.slane %v206_v54, 6 }
  0xa8   :  { %v255_v2 = vsel %vm249_vm1, %v193_v60, %v246_v61 }
  0xa9   :  { %v218_v56 = vpop.f32.mrf.mxu2 }
  0xaa   :  { %v219_v57 = vadd.f32 %v218_v56, %v77_v52  ;;  %v231_v58 = vpop.f32.mrf.mxu3  ;;  %v194_v59 = vpop.f32.mrf.mxu0 }
  0xab   :  { %v232_v62 = vadd.f32 %v231_v58, %v78_v55  ;;  %v207_v63 = vpop.f32.mrf.mxu1 }
  0xac   :  { %v247_v0 = vrot.slane %v219_v57, 4 }
  0xad   :  { %v248_v1 = vrot.slane %v232_v62, 2 }
  0xaf   :  { %v256_v3 = vsel %vm251_vm2, %v247_v0, %v248_v1 }
  0xb0   :  { %v257_v4 = vsel %vm253_vm3, %v255_v2, %v256_v3 }
  0xb1   :  { %v220_v5 = vpop.f32.mrf.mxu2  ;;  %261 = vst [vmem:[#allocation8 + $0x8] sm:$0xff] %v257_v4 }
  0xb2   :  { %v233_v6 = vpop.f32.mrf.mxu3  ;;  %272 = dma.vmem_to_hbm [thread:$0]  %s268_s2, 256, %s270_s30, [#allocation4]  }
  0xb3   :  { %434 = dma.done.wait [#allocation4], 256  }
  0xb4   :  { %435 = vsyncadd [#allocation4], 4294967040 }
  0xb5   :  { %277 = vsyncpa [#allocation3], 1 }
  0xb6   :  { %278 = vsyncpa [#allocation6], 1 }
  0xb7   :  { %279 = vsyncpa [#allocation4], 1 }

</bundles_post_ra>
